<compile_context>
chip_gen: v5e
topology: v5e:2x2
jax: 0.10.0
libtpu: 0.0.40
codegen_flags: <defaults>
</compile_context>

<pallas_src>
import jax
import jax.numpy as jnp
from jax.experimental import pallas as pl
from jax.experimental.pallas import tpu as pltpu


def _round_up(x, m):
    return ((x + m - 1) // m) * m


_NRING = 8  # number of row DMAs kept in flight per grid step


def _gather_kernel(ids_ref, table_ref, out_ref, sem):
    # ids_ref:   (n_pad,)      int32  SMEM (scalar prefetch)
    # table_ref: (V, Dp)       f32    HBM  (memory_space=pl.ANY, never fully loaded)
    # out_ref:   (tile_n, Dp)  f32    VMEM output block for this grid step
    # sem:       (_NRING,)     DMA semaphores (ring of in-flight row copies)
    tile_n = out_ref.shape[0]
    base = pl.program_id(0) * tile_n

    def start_copy(r, slot):
        row = ids_ref[base + r]
        pltpu.make_async_copy(
            table_ref.at[pl.ds(row, 1)],
            out_ref.at[pl.ds(r, 1)],
            sem.at[slot],
        ).start()

    def wait_copy(r, slot):
        # Wait only needs the transfer size + semaphore slot; all row copies
        # have identical (1, Dp) shape, so a fixed src descriptor is fine.
        pltpu.make_async_copy(
            table_ref.at[pl.ds(0, 1)],
            out_ref.at[pl.ds(r, 1)],
            sem.at[slot],
        ).wait()

    # Prime the ring: _NRING row gathers in flight.
    @pl.loop(0, _NRING)
    def _(r):
        start_copy(r, r)

    # Steady state: retire the oldest copy, immediately refill its slot.
    @pl.loop(0, tile_n - _NRING)
    def _(k):
        slot = k % _NRING
        nxt = k + _NRING
        row_nxt = ids_ref[base + nxt]  # scalar read before the wait
        wait_copy(k, slot)
        pltpu.make_async_copy(
            table_ref.at[pl.ds(row_nxt, 1)],
            out_ref.at[pl.ds(nxt, 1)],
            sem.at[slot],
        ).start()

    # Drain the last _NRING copies.
    @pl.loop(tile_n - _NRING, tile_n)
    def _(k):
        wait_copy(k, k % _NRING)


def _pick_tile(n, candidates=(64, 128, 256, 512)):
    """Tile size minimizing padding; on ties prefer >=2 grid steps (v7x), then
    the larger tile (fewer per-step overheads)."""
    best_key, best = None, None
    for t in candidates:
        n_pad = _round_up(n, t)
        steps = n_pad // t
        key = (n_pad, 0 if steps >= 2 else 1, -t)
        if best_key is None or key < best_key:
            best_key, best = key, (t, n_pad)
    return best


def gather_rows(ids, table):
    """out[i, :] = table[ids[i], :] with one Pallas DMA-gather kernel.

    ids:   (n,) int32 row indices
    table: (V, Dp) float32, Dp % 128 == 0 (lane-dense rows)
    """
    n = ids.shape[0]
    _, Dp = table.shape
    assert Dp % 128 == 0
    tile_n, n_pad = _pick_tile(n)
    # Padded rows gather row 0 (cheap, harmless) and are sliced off below.
    ids_p = jnp.zeros((n_pad,), jnp.int32).at[:n].set(ids.astype(jnp.int32))

    out = pl.pallas_call(
        _gather_kernel,
        out_shape=jax.ShapeDtypeStruct((n_pad, Dp), table.dtype),
        grid_spec=pltpu.PrefetchScalarGridSpec(
            num_scalar_prefetch=1,                    # ids -> SMEM
            grid=(n_pad // tile_n,),
            in_specs=[pl.BlockSpec(memory_space=pl.ANY)],   # table stays in HBM
            out_specs=pl.BlockSpec((tile_n, Dp), lambda i, ids: (i, 0)),
            scratch_shapes=[pltpu.SemaphoreType.DMA((_NRING,))],
        ),
        compiler_params=pltpu.CompilerParams(
            # VMEM footprint is only the double-buffered output tile
            # (<= 2*512*128*4 B = 512 KiB), far under the default scoped limit.
            dimension_semantics=("parallel",),
        ),
    )(ids_p, table)
    return out[:n]


class MyEmbeddingPallas:
    """JAX/Pallas equivalent of MyEmbedding's forward pass."""

    def __init__(self, key, embedding_dim, num_glove_vecs, word_pad_idx,
                 char_vocab, c_embedding_dim, char_pad_idx):
        k1, k2 = jax.random.split(key)
        # GloVe-like pretrained vectors (synthetic, deterministic), plus 2 pad
        # rows, matching: vecs = cat((GLOVE.vectors, zeros(2, D)), 0)
        glove_like = 0.1 * jax.random.normal(
            k1, (num_glove_vecs, embedding_dim), jnp.float32)
        pad = jnp.zeros((2, embedding_dim), jnp.float32)
        self.wtable = jnp.concatenate([glove_like, pad], axis=0)

        # nn.Embedding(char_vocab + 1, c_embedding_dim, padding_idx=...) —
        # N(0,1) init, padding row zeroed.
        ctable = jax.random.normal(k2, (char_vocab + 1, c_embedding_dim),
                                   jnp.float32)
        self.ctable = ctable.at[char_pad_idx].set(0.0)

        self.word_pad_idx = word_pad_idx
        self.char_pad_idx = char_pad_idx
        self.embedding_dim = embedding_dim
        self.c_embedding_dim = c_embedding_dim

        # ---- Fused lane-dense table, built ONCE and cached (perf item 1) ----
        Vw, Dw = self.wtable.shape
        Vc, Dc = self.ctable.shape
        Dp = _round_up(max(Dw, Dc), 128)
        wt = jnp.zeros((Vw, Dp), jnp.float32).at[:, :Dw].set(self.wtable)
        ct = jnp.zeros((Vc, Dp), jnp.float32).at[:, :Dc].set(self.ctable)
        self.fused_table = jnp.concatenate([wt, ct], axis=0)   # (Vw+Vc, Dp)
        self.char_offset = Vw
        self.Dp = Dp

    def __call__(self, data):
        word_ids, char_ids = data
        w_flat = word_ids.reshape(-1).astype(jnp.int32)
        c_flat = char_ids.reshape(-1).astype(jnp.int32) + self.char_offset
        nw, nc = w_flat.shape[0], c_flat.shape[0]

        # Place the char slab at a sublane-aligned row so the output slices
        # below don't force relayout copies (gap rows gather row 0, discarded).
        c_off = _round_up(nw, 8)
        n = c_off + nc
        ids = (jnp.zeros((n,), jnp.int32)
               .at[:nw].set(w_flat)
               .at[c_off:].set(c_flat))

        out = gather_rows(ids, self.fused_table)

        word_embeds = out[:nw, : self.embedding_dim].reshape(
            word_ids.shape + (self.embedding_dim,))
        char_embeds = out[c_off:c_off + nc, : self.c_embedding_dim].reshape(
            char_ids.shape + (self.c_embedding_dim,))
        return word_embeds, char_embeds


if __name__ == "__main__":
    key = jax.random.PRNGKey(0)
    k_params, k_w, k_c = jax.random.split(key, 3)

    # Small, shape-consistent synthetic setup:
    #   GloVe dim = 100, 62 pretrained vectors + 2 pad rows -> word table (64, 100)
    #   char vocab 47 (+1)                                  -> char table (48, 32)
    embedding_dim = 100
    num_glove_vecs = 62
    word_pad_idx = 62          # one of the appended pad rows
    char_vocab = 47
    c_embedding_dim = 32
    char_pad_idx = 47

    module = MyEmbeddingPallas(k_params, embedding_dim, num_glove_vecs,
                               word_pad_idx, char_vocab, c_embedding_dim,
                               char_pad_idx)

    # data[0]: word indices (batch=2, seq=8); data[1]: char indices (2, 8, 4)
    B, S, W = 2, 8, 4
    word_ids = jax.random.randint(k_w, (B, S), 0, num_glove_vecs + 2, jnp.int32)
    char_ids = jax.random.randint(k_c, (B, S, W), 0, char_vocab + 1, jnp.int32)

    word_embeds, char_embeds = module((word_ids, char_ids))
    jax.block_until_ready((word_embeds, char_embeds))

    # Sanity check against plain-JAX embedding lookup.
    ref_w = jnp.take(module.wtable, word_ids, axis=0)
    ref_c = jnp.take(module.ctable, char_ids, axis=0)
    assert word_embeds.shape == (B, S, embedding_dim)
    assert char_embeds.shape == (B, S, W, c_embedding_dim)
    assert jnp.allclose(word_embeds, ref_w, atol=1e-6)
    assert jnp.allclose(char_embeds, ref_c, atol=1e-6)

    print("KERNEL_OK")
</pallas_src>

<mosaic_0001>
module attributes {stable_mosaic.version = 11 : i64} {
  func.func @_gather_kernel(%arg0: i32, %arg1: memref<128xi32, #tpu.memory_space<smem>>, %arg2: memref<112x128xf32, #tpu.memory_space<any>>, %arg3: memref<64x128xf32, #tpu.memory_space<vmem>>, %arg4: memref<8x!tpu.dma_semaphore, #tpu.memory_space<semaphore_mem>>) attributes {dimension_semantics = [#tpu.dimension_semantics<parallel>], iteration_bounds = array<i64: 2>, scalar_prefetch = 1 : i64, scratch_operands = 1 : i64, tpu.core_type = #tpu.core_type<tc>, window_params = [{}, {transform_indices = @transform_1, window_bounds = array<i64: 64, 128>}]} {
    %c64_i32 = arith.constant 64 : i32
    %0 = arith.muli %arg0, %c64_i32 : i32
    %c0_i32 = arith.constant 0 : i32
    %c8_i32 = arith.constant 8 : i32
    %1 = arith.addi %c0_i32, %c8_i32 : i32
    %c1_i32 = arith.constant 1 : i32
    scf.for %arg5 = %c0_i32 to %1 step %c1_i32  : i32 {
      %c1_i32_8 = arith.constant 1 : i32
      %4 = arith.muli %arg5, %c1_i32_8 : i32
      %c0_i32_9 = arith.constant 0 : i32
      %5 = arith.addi %c0_i32_9, %4 : i32
      %6 = arith.addi %0, %5 : i32
      %7 = arith.index_cast %6 : i32 to index
      %8 = memref.load %arg1[%7] : memref<128xi32, #tpu.memory_space<smem>>
      %c0_i32_10 = arith.constant 0 : i32
      %9 = tpu.memref_slice %arg2[%8, %c0_i32_10] : memref<112x128xf32, #tpu.memory_space<any>> -> memref<1x128xf32, #tpu.memory_space<any>>
      %c0_i32_11 = arith.constant 0 : i32
      %10 = tpu.memref_slice %arg3[%5, %c0_i32_11] : memref<64x128xf32, #tpu.memory_space<vmem>> -> memref<1x128xf32, #tpu.memory_space<vmem>>
      %11 = tpu.memref_slice %arg4[%5] : memref<8x!tpu.dma_semaphore, #tpu.memory_space<semaphore_mem>> -> memref<1x!tpu.dma_semaphore, #tpu.memory_space<semaphore_mem>>
      %12 = tpu.memref_squeeze %11 : memref<1x!tpu.dma_semaphore, #tpu.memory_space<semaphore_mem>> -> memref<!tpu.dma_semaphore, #tpu.memory_space<semaphore_mem>>
      tpu.enqueue_dma source(%9 : memref<1x128xf32, #tpu.memory_space<any>>) target(%10 : memref<1x128xf32, #tpu.memory_space<vmem>>) target_semaphore(%12 : memref<!tpu.dma_semaphore, #tpu.memory_space<semaphore_mem>>)
    }
    %c8_i32_0 = arith.constant 8 : i32
    %c0_i32_1 = arith.constant 0 : i32
    %c56_i32 = arith.constant 56 : i32
    %2 = arith.addi %c0_i32_1, %c56_i32 : i32
    %c1_i32_2 = arith.constant 1 : i32
    scf.for %arg5 = %c0_i32_1 to %2 step %c1_i32_2  : i32 {
      %c1_i32_8 = arith.constant 1 : i32
      %4 = arith.muli %arg5, %c1_i32_8 : i32
      %c0_i32_9 = arith.constant 0 : i32
      %5 = arith.addi %c0_i32_9, %4 : i32
      %c8_i32_10 = arith.constant 8 : i32
      %c0_i32_11 = arith.constant 0 : i32
      %6 = arith.cmpi eq, %c8_i32_10, %c0_i32_11 : i32
      %c1_i32_12 = arith.constant 1 : i32
      %7 = arith.select %6, %c1_i32_12, %c8_i32_10 : i32
      %8 = arith.remsi %5, %7 : i32
      %c0_i32_13 = arith.constant 0 : i32
      %9 = arith.cmpi ne, %8, %c0_i32_13 : i32
      %c0_i32_14 = arith.constant 0 : i32
      %10 = arith.cmpi slt, %8, %c0_i32_14 : i32
      %c0_i32_15 = arith.constant 0 : i32
      %11 = arith.cmpi slt, %7, %c0_i32_15 : i32
      %12 = arith.xori %10, %11 : i1
      %13 = arith.andi %12, %9 : i1
      %14 = arith.addi %8, %7 : i32
      %15 = arith.select %13, %14, %8 : i32
      %c8_i32_16 = arith.constant 8 : i32
      %16 = arith.addi %5, %c8_i32_16 : i32
      %17 = arith.addi %0, %16 : i32
      %18 = arith.index_cast %17 : i32 to index
      %19 = memref.load %arg1[%18] : memref<128xi32, #tpu.memory_space<smem>>
      %c0_i32_17 = arith.constant 0 : i32
      %c0_i32_18 = arith.constant 0 : i32
      %20 = tpu.memref_slice %arg2[%c0_i32_17, %c0_i32_18] : memref<112x128xf32, #tpu.memory_space<any>> -> memref<1x128xf32, #tpu.memory_space<any>>
      %c0_i32_19 = arith.constant 0 : i32
      %21 = tpu.memref_slice %arg3[%5, %c0_i32_19] : memref<64x128xf32, #tpu.memory_space<vmem>> -> memref<1x128xf32, #tpu.memory_space<vmem>>
      %22 = tpu.memref_slice %arg4[%15] : memref<8x!tpu.dma_semaphore, #tpu.memory_space<semaphore_mem>> -> memref<1x!tpu.dma_semaphore, #tpu.memory_space<semaphore_mem>>
      %23 = tpu.memref_squeeze %22 : memref<1x!tpu.dma_semaphore, #tpu.memory_space<semaphore_mem>> -> memref<!tpu.dma_semaphore, #tpu.memory_space<semaphore_mem>>
      tpu.wait_dma2 semaphore(%23 : memref<!tpu.dma_semaphore, #tpu.memory_space<semaphore_mem>>) src(%20 : memref<1x128xf32, #tpu.memory_space<any>>) dst(%21 : memref<1x128xf32, #tpu.memory_space<vmem>>)
      %c0_i32_20 = arith.constant 0 : i32
      %24 = tpu.memref_slice %arg2[%19, %c0_i32_20] : memref<112x128xf32, #tpu.memory_space<any>> -> memref<1x128xf32, #tpu.memory_space<any>>
      %c0_i32_21 = arith.constant 0 : i32
      %25 = tpu.memref_slice %arg3[%16, %c0_i32_21] : memref<64x128xf32, #tpu.memory_space<vmem>> -> memref<1x128xf32, #tpu.memory_space<vmem>>
      %26 = tpu.memref_slice %arg4[%15] : memref<8x!tpu.dma_semaphore, #tpu.memory_space<semaphore_mem>> -> memref<1x!tpu.dma_semaphore, #tpu.memory_space<semaphore_mem>>
      %27 = tpu.memref_squeeze %26 : memref<1x!tpu.dma_semaphore, #tpu.memory_space<semaphore_mem>> -> memref<!tpu.dma_semaphore, #tpu.memory_space<semaphore_mem>>
      tpu.enqueue_dma source(%24 : memref<1x128xf32, #tpu.memory_space<any>>) target(%25 : memref<1x128xf32, #tpu.memory_space<vmem>>) target_semaphore(%27 : memref<!tpu.dma_semaphore, #tpu.memory_space<semaphore_mem>>)
    }
    %c56_i32_3 = arith.constant 56 : i32
    %c0_i32_4 = arith.constant 0 : i32
    %c8_i32_5 = arith.constant 8 : i32
    %3 = arith.addi %c0_i32_4, %c8_i32_5 : i32
    %c1_i32_6 = arith.constant 1 : i32
    scf.for %arg5 = %c0_i32_4 to %3 step %c1_i32_6  : i32 {
      %c1_i32_8 = arith.constant 1 : i32
      %4 = arith.muli %arg5, %c1_i32_8 : i32
      %c56_i32_9 = arith.constant 56 : i32
      %5 = arith.addi %c56_i32_9, %4 : i32
      %c8_i32_10 = arith.constant 8 : i32
      %c0_i32_11 = arith.constant 0 : i32
      %6 = arith.cmpi eq, %c8_i32_10, %c0_i32_11 : i32
      %c1_i32_12 = arith.constant 1 : i32
      %7 = arith.select %6, %c1_i32_12, %c8_i32_10 : i32
      %8 = arith.remsi %5, %7 : i32
      %c0_i32_13 = arith.constant 0 : i32
      %9 = arith.cmpi ne, %8, %c0_i32_13 : i32
      %c0_i32_14 = arith.constant 0 : i32
      %10 = arith.cmpi slt, %8, %c0_i32_14 : i32
      %c0_i32_15 = arith.constant 0 : i32
      %11 = arith.cmpi slt, %7, %c0_i32_15 : i32
      %12 = arith.xori %10, %11 : i1
      %13 = arith.andi %12, %9 : i1
      %14 = arith.addi %8, %7 : i32
      %15 = arith.select %13, %14, %8 : i32
      %c0_i32_16 = arith.constant 0 : i32
      %c0_i32_17 = arith.constant 0 : i32
      %16 = tpu.memref_slice %arg2[%c0_i32_16, %c0_i32_17] : memref<112x128xf32, #tpu.memory_space<any>> -> memref<1x128xf32, #tpu.memory_space<any>>
      %c0_i32_18 = arith.constant 0 : i32
      %17 = tpu.memref_slice %arg3[%5, %c0_i32_18] : memref<64x128xf32, #tpu.memory_space<vmem>> -> memref<1x128xf32, #tpu.memory_space<vmem>>
      %18 = tpu.memref_slice %arg4[%15] : memref<8x!tpu.dma_semaphore, #tpu.memory_space<semaphore_mem>> -> memref<1x!tpu.dma_semaphore, #tpu.memory_space<semaphore_mem>>
      %19 = tpu.memref_squeeze %18 : memref<1x!tpu.dma_semaphore, #tpu.memory_space<semaphore_mem>> -> memref<!tpu.dma_semaphore, #tpu.memory_space<semaphore_mem>>
      tpu.wait_dma2 semaphore(%19 : memref<!tpu.dma_semaphore, #tpu.memory_space<semaphore_mem>>) src(%16 : memref<1x128xf32, #tpu.memory_space<any>>) dst(%17 : memref<1x128xf32, #tpu.memory_space<vmem>>)
    }
    %c8_i32_7 = arith.constant 8 : i32
    return
  }
  func.func @transform_1(%arg0: i32, %arg1: memref<128xi32, #tpu.memory_space<smem>>) -> (i32, i32) {
    %c0_i32 = arith.constant 0 : i32
    %c0_i32_0 = arith.constant 0 : i32
    return %arg0, %c0_i32 : i32, i32
  }
}

</mosaic_0001>

<bundles_post_ra>
// kernel: tpu_custom_call.1
= control target key start
LH: loop header
LB: loop body
LE: loop exit
PB: predicated region body
PF: predicated region fallthrough
CT: control target
= control target key end

     0   :  { %s514_s12 = smov [#allocation4]   ;;  %s675_s0 = inlined_call_operand.hbm [shape: s32[128], index: 0, kind: input, shape index: {}]   ;;  %s676_s1 = inlined_call_operand.hbm [shape: f32[112,128], index: 1, kind: input, shape index: {}]   ;;  %s677_s2 = inlined_call_operand.hbm [shape: f32[128,128], index: 2, kind: output, shape index: {}]  }
   0x1   :  { %s8_s11 = sshll.u32 %s675_s0, 4  ;;  %s9_s11 = int_to_ptr.hbm [resolvable:$true] %s8_s11 }
   0x2   :  { %11 = dma.hbm_to_smem %s9_s11, 16, %s514_s12, [#allocation3] }
   0x3   :  { %480 = dma.done.wait [#allocation3], 16 }
   0x4   :  { %481 = vsyncadd [#allocation3], 4294967280 }
   0x5   :  { %14 = sfence }
   0x6   :  { %15 = vsyncpa [#allocation6], 0 }
   0x7   :  { %17 = vsyncpa [#allocation6 + $0x1], 0  ;;  %s536_s13 = smov 0   ;;  %s538_s14 = smov 0  }
   0x8   :  { %s540_s15 = smov 0  }
   0x9 LB: > { %s285_s0 = sadd.s32 4294967295, %s500_s15   ;;  %s553_s16 = sadd.s32 1, %s500_s15   ;;  %s500_s15 = sphi %s540_s15, %s682_s15   ;;  %s496_s14 = sphi %s538_s14, %s681_s14   ;;  %s492_s13 = sphi %s536_s13, %s680_s13  }
   0xa   : > { %s26_s17 = ssub.s32 %s500_s15, %s553_s16  ;;  %s29_s18 = sadd.s32 1, %s496_s14 }
   0xb   : > { %p27_p0 = scmp.eq.s32.totalorder %s26_s17, 0  ;;  %p286_p1 = scmp.ne.s32.totalorder %s26_s17, 0 }
   0xc   : > { %p33_p2 = scmp.eq.s32.totalorder %s500_s15, 1  ;;  %p38_p3 = scmp.ne.s32.totalorder %s496_s14, %s492_s13 }
   0xd   : > { %s562_s19 = scalar_select %p27_p0, %s496_s14, %s29_s18  }
   0xe   : > { %p564_p4 = por %p286_p1, %p33_p2  ;;  %p39_p5 = scmp.eq.s32.totalorder %s285_s0, 1 }
   0xf   : > { %p287_p7 = scmp.ge.s32.totalorder %s500_s15, 2 }
  0x10   : > { %p568_p6 = por %p39_p5, %p38_p3  ;;  %s53_s22 = sand.u32 (!%p287_p7), 1, %s496_s14  }
  0x11   : > { %48 = sbr.rel (%p287_p7) target bundleno = 126 (0x7e), region = 12  ;;  %s575_s23 = sshll.u32 (!%p287_p7), %s500_s15, 6 }
  0x12   : > { %s288_s24 = sshll.u32 (!%p287_p7), %s53_s22, 6  ;;  %s581_s26 = smov (!%p287_p7), 0  }
  0x13   : > { %s579_s25 = scalar_lea.vmem (!%p287_p7), [#allocation5], %s288_s24 }
  0x16 LB: >> { %s64_s27 = sadd.s32 %s504_s26, %s575_s23  ;;  %s67_s29 = scalar_lea.vmem %s579_s25, %s504_s26 [#allocation5]  ;;  %s504_s26 = sphi %s581_s26, %s63_s26  }
  0x17   : >> { %s65_s28 = sld [smem:[#allocation4 + %s64_s27]]  ;;  %s590_s30 = sshll.u32 %s67_s29, 4  ;;  %s79_s30 = int_to_ptr.vmem [resolvable:$true] %s590_s30 }
  0x18   : >> { %s68_s7 = scalar_lea.sflag [#allocation2], %s504_s26  ;;  %s384_s12 = scalar_lea.hbm %s676_s1, 112 }
  0x1d   : >> { %s66_s5 = scalar_lea.hbm %s676_s1, %s65_s28 }
  0x1e   : >> { %s76_s6 = sshll.u32 %s66_s5, 4  ;;  %s77_s6 = int_to_ptr.hbm [resolvable:$true] %s76_s6 }
  0x1f   : >> { %s380_s8 = sshra.s32 %s77_s6, 4  ;;  %s381_s8 = int_to_ptr.hbm [resolvable:$true] %s380_s8 }
  0x20   : >> { %s382_s9 = scalar_lea.hbm %s381_s8, 1  ;;  %p385_p9 = scmp.lt.s32.totalorder %s381_s8, %s676_s1 }
  0x21   : >> { %p383_p8 = scmp.ne.s32.totalorder %s381_s8, %s382_s9  ;;  %p386_p10 = scmp.lt.s32.totalorder %s384_s12, %s382_s9 }
  0x23   : >> { %p387_p11 = por %p386_p10, %p385_p9 }
  0x25   : >> { %p388_p12 = pnand %p387_p11, %p383_p8 }
  0x27   : >> { %391 = shalt.err (!%p388_p12)  }
  0x28   : >> { %s392_s27 = sshra.s32 %s79_s30, 4  ;;  %s515_s29 = smov [#allocation5]   ;;  %s393_s27 = int_to_ptr.vmem [resolvable:$true] %s392_s27 }
  0x29   : >> { %s394_s28 = scalar_lea.vmem %s393_s27, 1  ;;  %s607_s3 = scalar_lea.vmem %s515_s29, 128 }
  0x2a   : >> { %p395_p13 = scmp.ne.s32.totalorder %s393_s27, %s394_s28  ;;  %p397_p0 = scmp.lt.s32.totalorder %s393_s27, [#allocation5] }
  0x2b   : >> { %p398_p1 = scmp.lt.s32.totalorder %s607_s3, %s394_s28 }
  0x2d   : >> { %p399_p2 = por %p398_p1, %p397_p0 }
  0x2f   : >> { %p400_p3 = pnand %p399_p2, %p395_p13 }
  0x31   : >> { %403 = shalt.err (!%p400_p3)  }
  0x32   : >> { %81 = dma.hbm_to_vmem [thread:$0]  %s77_s6, 16, %s79_s30, %s68_s7 }
  0x33   : >> { %s63_s26 = sadd.s32 1, %s504_s26  }
  0x34   : >> { %p60_p5 = scmp.ge.s32.totalorder %s63_s26, 8  }
  0x35   : > { %s613_s4 = smov (%p60_p5), 0  }
  0x36   : > { %62 = sbr.rel (!%p60_p5) target bundleno = 22 (0x16), region = 87 }
  0x3b LB: >> { %p88_p7 = scmp.lt.s32.totalorder %s508_s4, 0  ;;  %s89_s30 = ssub.s32 0, %s508_s4  ;;  %s508_s4 = sphi %s613_s4, %s87_s4  }
  0x3c   : >> { %s290_s5 = smin.u32 %s508_s4, %s89_s30  ;;  %s100_s6 = sadd.s32 8, %s508_s4 }
  0x3d   : >> { %s91_s7 = sand.u32 7, %s290_s5   ;;  %s101_s8 = sadd.s32 %s575_s23, %s100_s6 }
  0x3e   : >> { %s92_s26 = ssub.s32 0, %s91_s7  ;;  %s102_s9 = sld [smem:[#allocation4 + %s101_s8]] }
  0x3f   : >> { %s684_s26 = smov (!%p88_p7, %s92_s26), %s91_s7 }
  0x40   : >> { %p292_p8 = scmp.lt.s32.totalorder %s684_s26, 0  ;;  %s98_s10 = sadd.s32 8, %s684_s26 }
  0x42   : >> { %s686_s10 = smov (!%p292_p8, %s98_s10), %s684_s26 }
  0x43   : >> { %s623_s11 = scalar_lea.sflag [#allocation2], %s686_s10 }
  0x44   : >> { %482 = dma.done.wait %s623_s11, 16 }
  0x45   : >> { %483 = vsyncadd %s623_s11, 4294967280  ;;  %s107_s18 = scalar_lea.hbm %s676_s1, %s102_s9  ;;  %s248_s24 = scalar_lea.vmem %s579_s25, %s508_s4 [#allocation5] }
  0x46   : >> { %s249_s27 = scalar_lea.vmem %s248_s24, 8 [#allocation5]  ;;  %s116_s28 = sshll.u32 %s107_s18, 4  ;;  %s117_s28 = int_to_ptr.hbm [resolvable:$true] %s116_s28 }
  0x47   : >> { %s118_s29 = sshll.u32 %s249_s27, 4  ;;  %s404_s30 = sshra.s32 %s117_s28, 4  ;;  %s119_s29 = int_to_ptr.vmem [resolvable:$true] %s118_s29  ;;  %s405_s30 = int_to_ptr.hbm [resolvable:$true] %s404_s30 }
  0x48   : >> { %s406_s5 = scalar_lea.hbm %s405_s30, 1  ;;  %p409_p10 = scmp.lt.s32.totalorder %s405_s30, %s676_s1 }
  0x49   : >> { %p407_p9 = scmp.ne.s32.totalorder %s405_s30, %s406_s5  ;;  %p410_p11 = scmp.lt.s32.totalorder %s384_s12, %s406_s5 }
  0x4b   : >> { %p411_p12 = por %p410_p11, %p409_p10 }
  0x4d   : >> { %p412_p13 = pnand %p411_p12, %p407_p9 }
  0x4f   : >> { %415 = shalt.err (!%p412_p13)  }
  0x50   : >> { %s416_s9 = sshra.s32 %s119_s29, 4  ;;  %s417_s9 = int_to_ptr.vmem [resolvable:$true] %s416_s9 }
  0x51   : >> { %s418_s10 = scalar_lea.vmem %s417_s9, 1  ;;  %p421_p1 = scmp.lt.s32.totalorder %s417_s9, [#allocation5] }
  0x52   : >> { %p419_p0 = scmp.ne.s32.totalorder %s417_s9, %s418_s10  ;;  %p422_p2 = scmp.lt.s32.totalorder %s607_s3, %s418_s10 }
  0x54   : >> { %p423_p3 = por %p422_p2, %p421_p1 }
  0x56   : >> { %p424_p5 = pnand %p423_p3, %p419_p0 }
  0x58   : >> { %427 = shalt.err (!%p424_p5)  }
  0x59   : >> { %121 = dma.hbm_to_vmem [thread:$0]  %s117_s28, 16, %s119_s29, %s623_s11 }
  0x5a   : >> { %s87_s4 = sadd.s32 1, %s508_s4  }
  0x5b   : >> { %p84_p7 = scmp.ge.s32.totalorder %s87_s4, 56  }
  0x5c   : > { %s510_s0 = smov (%p84_p7), 0  }
  0x5d   : > { %86 = sbr.rel (!%p84_p7) target bundleno = 59 (0x3b), region = 98 }
  0x62 LB: >> { %s128_s17 = sadd.s32 56, %s512_s0  ;;  %s512_s0 = sphi %s510_s0, %s127_s0  }
  0x63   : >> { %p129_p8 = scmp.lt.s32.totalorder %s128_s17, 0  ;;  %s130_s18 = ssub.s32 0, %s128_s17 }
  0x64   : >> { %s293_s24 = smin.u32 %s130_s18, %s128_s17 }
  0x65   : >> { %s132_s27 = sand.u32 7, %s293_s24  }
  0x66   : >> { %s133_s30 = ssub.s32 0, %s132_s27 }
  0x67   : >> { %s688_s30 = smov (!%p129_p8, %s133_s30), %s132_s27 }
  0x68   : >> { %p295_p9 = scmp.lt.s32.totalorder %s688_s30, 0  ;;  %s139_s5 = sadd.s32 8, %s688_s30 }
  0x6a   : >> { %s690_s5 = smov (!%p295_p9, %s139_s5), %s688_s30 }
  0x6b   : >> { %s141_s11 = scalar_lea.sflag [#allocation2], %s690_s5 }
  0x6c   : >> { %484 = dma.done.wait %s141_s11, 16 }
  0x6d   : >> { %485 = vsyncadd %s141_s11, 4294967280  ;;  %s127_s0 = sadd.s32 1, %s512_s0  }
  0x6e   : >> { %p124_p10 = scmp.ge.s32.totalorder %s127_s0, 8  }
  0x6f   : > { %s157_s4 = scalar_lea.hbm (%p124_p10), %s677_s2, %s575_s23  ;;  %s158_s28 = sshll.u32 (%p124_p10), %s579_s25, 4  ;;  %s159_s28 = int_to_ptr.vmem [resolvable:$true] %s158_s28 }
  0x70   : > { %126 = sbr.rel (!%p124_p10) target bundleno = 98 (0x62), region = 109  ;;  %s160_s29 = sshll.u32 (%p124_p10), %s157_s4, 4  ;;  %s161_s29 = int_to_ptr.hbm [resolvable:$true] %s160_s29 }
  0x71   : > { %s146_s6 = scalar_lea.sflag (%p124_p10), [#allocation6], %s53_s22  ;;  %s442_s7 = sshra.s32 (%p124_p10), %s161_s29, 4  ;;  %s443_s7 = int_to_ptr.hbm [resolvable:$true] %s442_s7 }
  0x72   : > { %s444_s8 = scalar_lea.hbm (%p124_p10), %s443_s7, 64  ;;  %s448_s10 = scalar_lea.hbm (%p124_p10), %s677_s2, 128 }
  0x73   : > { %p445_p11 = scmp.ne.s32.totalorder (%p124_p10), %s443_s7, %s444_s8  ;;  %p449_p0 = scmp.lt.s32.totalorder (%p124_p10), %s443_s7, %s677_s2 }
  0x74   : > { %p450_p1 = scmp.lt.s32.totalorder (%p124_p10), %s448_s10, %s444_s8 }
  0x75   : > { %p446_p12 = pnand %p445_p11, %p564_p4 }
  0x76   : > { %p451_p2 = por %p450_p1, %p449_p0 }
  0x77   : > { %p447_p13 = pneg %p446_p12 }
  0x79   : > { %p452_p3 = pnand %p451_p2, %p447_p13 }
  0x7b   : > { %455 = shalt.err (!%p452_p3)
}
  0x7c   : > { %s516_s22 = smov 128   ;;  %s517_s23 = smov 8  }
  0x7d   : > { %310 = dma.vmem_to_hbm [thread:$0]  (%p564_p4), %s159_s28, 1024, %s161_s29, %s146_s6, %s516_s22, %s516_s22, %s517_s23  }
  0x7e PF: > { %p316_p5 = scmp.ge.s32.totalorder %s500_s15, 1  ;;  %s175_s25 = sand.u32 1, %s492_s13  }
  0x7f   : > { %s176_s18 = scalar_lea.sflag [#allocation6], %s175_s25 }
  0x80   : > { %p313_p7 = pnand %p316_p5, %p568_p6 }
  0x82   : > { %p314_p8 = pneg %p313_p7 }
  0x84   : > { %487 = dma.done.wait (%p314_p8), %s176_s18, 1024  }
  0x85   : > { %489 = vsyncadd (%p314_p8), %s176_s18, 4294966272  ;;  %p20_p9 = scmp.ge.s32.totalorder %s553_s16, 3   ;;  %s680_s13 = smov %s496_s14 }
  0x86   : > { %s681_s14 = smov %s562_s19  ;;  %s682_s15 = smov %s553_s16 }
  0x87   :  { %22 = sbr.rel (!%p20_p9) target bundleno = 9 (0x9), region = 120 }
  0x8c   :  { %182 = vsyncpa [#allocation6], 1 }
  0x8d   :  { %184 = vsyncpa [#allocation6 + $0x1], 1 }
  0x8e   :  { %185 = vsyncmov [#allocation2] }
  0x91   :  { %s186_s15 = vpop.sfrf %185 }
  0x92   :  { %p301_p4 = scmp.ne.s32.totalorder %s186_s15, 0 }
  0x94   :  { %190 = shalt.err (%p301_p4)  }
  0x95   :  { %192 = vsyncmov [#allocation2 + $0x1] }
  0x98   :  { %s193_s20 = vpop.sfrf %192 }
  0x99   :  { %p302_p6 = scmp.ne.s32.totalorder %s193_s20, 0 }
  0x9b   :  { %197 = shalt.err (%p302_p6)  }
  0x9c   :  { %199 = vsyncmov [#allocation2 + $0x2] }
  0x9f   :  { %s200_s21 = vpop.sfrf %199 }
  0xa0   :  { %p303_p10 = scmp.ne.s32.totalorder %s200_s21, 0 }
  0xa2   :  { %204 = shalt.err (%p303_p10)  }
  0xa3   :  { %206 = vsyncmov [#allocation2 + $0x3] }
  0xa6   :  { %s207_s24 = vpop.sfrf %206 }
  0xa7   :  { %p304_p11 = scmp.ne.s32.totalorder %s207_s24, 0 }
  0xa9   :  { %211 = shalt.err (%p304_p11)  }
  0xaa   :  { %213 = vsyncmov [#allocation2 + $0x4] }
  0xad   :  { %s214_s16 = vpop.sfrf %213 }
  0xae   :  { %p305_p12 = scmp.ne.s32.totalorder %s214_s16, 0 }
  0xb0   :  { %218 = shalt.err (%p305_p12)  }
  0xb1   :  { %220 = vsyncmov [#allocation2 + $0x5] }
  0xb4   :  { %s221_s1 = vpop.sfrf %220 }
  0xb5   :  { %p306_p13 = scmp.ne.s32.totalorder %s221_s1, 0 }
  0xb7   :  { %225 = shalt.err (%p306_p13)  }
  0xb8   :  { %227 = vsyncmov [#allocation2 + $0x6] }
  0xbb   :  { %s228_s2 = vpop.sfrf %227 }
  0xbc   :  { %p307_p0 = scmp.ne.s32.totalorder %s228_s2, 0 }
  0xbe   :  { %232 = shalt.err (%p307_p0)  }
  0xbf   :  { %234 = vsyncmov [#allocation2 + $0x7] }
  0xc2   :  { %s235_s13 = vpop.sfrf %234 }
  0xc3   :  { %p308_p1 = scmp.ne.s32.totalorder %s235_s13, 0 }
  0xc5   :  { %239 = shalt.err (%p308_p1)  }

</bundles_post_ra>
